<compile_context>
chip_gen: v7x
topology: tpu7x:2x2x1
jax: 0.10.0
libtpu: 0.0.40
codegen_flags: <defaults>
</compile_context>

<pallas_src>
import functools

import jax
import jax.numpy as jnp
from jax.experimental import pallas as pl
from jax.experimental.pallas import tpu as pltpu

LANE = 128
NEG_INF = -1e30


def _tpu_generation():
    try:
        kind = jax.devices()[0].device_kind.lower()
    except Exception:
        kind = ""
    if "v7" in kind:
        return "v7"
    if "v6" in kind:
        return "v6"
    return "other"


_GEN = _tpu_generation()
if _GEN == "v7":      # 2 TensorCores, 64 MiB VMEM, bf16 EUP, 256-wide MXU
    TILE_DST, VMEM_LIMIT, USE_BF16_EXP = 256, 48 * 1024 * 1024, True
elif _GEN == "v6":    # 128 MiB VMEM, bf16 EUP, 256-wide MXU
    TILE_DST, VMEM_LIMIT, USE_BF16_EXP = 256, 96 * 1024 * 1024, True
else:                 # v5e / unknown: 128-wide MXU, no bf16 EUP/VPU path
    TILE_DST, VMEM_LIMIT, USE_BF16_EXP = 128, 64 * 1024 * 1024, False


# ----------------------------------------------------------------------------- utils
def _round_up(v, m):
    return ((v + m - 1) // m) * m


def _head_cols(heads, c, c_pad):
    """Padded column index of real feature (h, c): h * c_pad + c, flattened h-major."""
    return (jnp.arange(heads)[:, None] * c_pad + jnp.arange(c)[None, :]).reshape(-1)


def _embed(w, row_idx, col_idx, shape):
    """Scatter a dense [R, C] weight into a zero-padded [shape] slab (f32)."""
    out = jnp.zeros(shape, jnp.float32)
    return out.at[row_idx[:, None], col_idx[None, :]].set(w.astype(jnp.float32))


def _pack_att_cols(att, c_pad):
    """Pack a [H, C] attention vector into a [H*c_pad, LANE] bf16 matrix so that
    xw @ mat yields the per-head alpha value in output lane h (lane-dense, no
    transposes on the kernel critical path)."""
    heads, c = att.shape
    rows = _head_cols(heads, c, c_pad)          # position inside D = H * c_pad
    cols = jnp.repeat(jnp.arange(heads), c)     # head index -> output lane
    mat = jnp.zeros((heads * c_pad, LANE), jnp.float32)
    mat = mat.at[rows, cols].set(att.reshape(-1).astype(jnp.float32))
    return mat.astype(jnp.bfloat16)


def build_adjacency(edge_index, n_pad):
    """int8 adjacency: 1 where edge j->i or self loop, 0 otherwise.  GATConv
    semantics (add_self_loops=True): existing self loops collapse with the added
    one; padded nodes also get a self loop so every softmax row stays finite.
    Built directly in int8 to avoid N^2 f32 intermediates and halve mask DMA."""
    src, dst = edge_index[0], edge_index[1]
    adj = jnp.zeros((n_pad, n_pad), jnp.int8)
    adj = adj.at[dst, src].set(jnp.int8(1))
    diag = jnp.arange(n_pad)
    adj = adj.at[diag, diag].set(jnp.int8(1))
    return adj


# ------------------------------------------------------- projection + alpha kernel
def _proj_kernel(x_ref, w_ref, asrc_ref, adst_ref, xw_ref, asrc_out_ref, adst_out_ref):
    # bf16 MXU matmul with f32 accumulation; xw kept bf16 end-to-end downstream.
    xw = jnp.dot(x_ref[...], w_ref[...], preferred_element_type=jnp.float32)
    xw_bf = xw.astype(jnp.bfloat16)
    xw_ref[...] = xw_bf
    # Per-head alpha vectors, computed once per layer (not per destination tile).
    asrc_out_ref[...] = jnp.dot(xw_bf, asrc_ref[...], preferred_element_type=jnp.float32)
    adst_out_ref[...] = jnp.dot(xw_bf, adst_ref[...], preferred_element_type=jnp.float32)


def project_and_alpha(x_p, w_p, att_src_mat, att_dst_mat, tile):
    """xw = x_p @ w_p (bf16 out) plus alpha_src^T / alpha_dst, row-tiled over nodes."""
    n_pad, f_pad = x_p.shape
    d_pad = w_p.shape[1]
    cost = pl.CostEstimate(
        flops=int(2 * n_pad * f_pad * d_pad + 4 * n_pad * d_pad * LANE),
        transcendentals=0,
        bytes_accessed=int(2 * (n_pad * f_pad + f_pad * d_pad + n_pad * d_pad
                                + 2 * d_pad * LANE) + 8 * n_pad * LANE))
    return pl.pallas_call(
        _proj_kernel,
        out_shape=(jax.ShapeDtypeStruct((n_pad, d_pad), jnp.bfloat16),
                   jax.ShapeDtypeStruct((n_pad, LANE), jnp.float32),
                   jax.ShapeDtypeStruct((n_pad, LANE), jnp.float32)),
        grid=(n_pad // tile,),
        in_specs=[pl.BlockSpec((tile, f_pad), lambda i: (i, 0)),
                  pl.BlockSpec((f_pad, d_pad), lambda i: (0, 0)),
                  pl.BlockSpec((d_pad, LANE), lambda i: (0, 0)),
                  pl.BlockSpec((d_pad, LANE), lambda i: (0, 0))],
        out_specs=(pl.BlockSpec((tile, d_pad), lambda i: (i, 0)),
                   pl.BlockSpec((tile, LANE), lambda i: (i, 0)),
                   pl.BlockSpec((tile, LANE), lambda i: (i, 0))),
        compiler_params=pltpu.CompilerParams(
            dimension_semantics=("parallel",),
            vmem_limit_bytes=VMEM_LIMIT),
        cost_estimate=cost,
    )(x_p, w_p, att_src_mat, att_dst_mat)


# ---------------------------------------------------------------- attention kernel
def _gat_attn_kernel(adst_ref, asrc_ref, bias_ref, adj_ref, xw_ref, out_ref, *,
                     heads, c_pad, negative_slope, activation, use_bf16_exp):
    """Attention + aggregation for one tile of destination nodes.

    adst_ref: [TILE, LANE]   precomputed alpha_dst (head h in lane h), f32
    asrc_ref: [8+, N_pad]    precomputed alpha_src (head h in row h), f32
    bias_ref: [1, H*C_pad]   f32
    adj_ref:  [TILE, N_pad]  int8 adjacency (1 = edge/self-loop)
    xw_ref:   [N_pad, H*C_pad] projected features, bf16, VMEM-resident
    out_ref:  [TILE, H*C_pad]
    """
    # int8 -> f32 additive mask, once per tile (shared across heads).
    madd = jnp.where(adj_ref[...] > 0, 0.0, NEG_INF)             # [TILE, N_pad] f32

    for h in range(heads):            # static unroll; each head is fully lane-dense
        lo = h * c_pad
        s = adst_ref[:, h:h + 1] + asrc_ref[h:h + 1, :]          # [TILE, N_pad]
        s = jnp.maximum(s, negative_slope * s)                   # LeakyReLU (slope < 1)
        s = s + madd                                             # mask in f32 path
        m = jnp.max(s, axis=-1, keepdims=True)                   # finite: self-loop/row
        if use_bf16_exp:                                         # bf16 EUP (v6e/v7x)
            e = jnp.exp((s - m).astype(jnp.bfloat16))
            denom = jnp.sum(e, axis=-1, keepdims=True, dtype=jnp.float32)
        else:                                                    # f32 path (v5e)
            e_f = jnp.exp(s - m)                                 # masked -> exactly 0
            denom = jnp.sum(e_f, axis=-1, keepdims=True)
            e = e_f.astype(jnp.bfloat16)
        # Aggregate UNnormalized weights, then rescale the small [TILE, c_pad] result.
        agg = jnp.dot(e, xw_ref[:, lo:lo + c_pad],
                      preferred_element_type=jnp.float32)        # [TILE, C_pad]
        res = agg * pl.reciprocal(denom, approx=True) + bias_ref[:, lo:lo + c_pad]
        if activation == "relu":
            res = jnp.maximum(res, 0.0)
        elif activation == "sigmoid":
            res = jax.nn.sigmoid(res)
        out_ref[:, lo:lo + c_pad] = res.astype(out_ref.dtype)    # 128-lane-aligned store


def gat_attention(alpha_dst, alpha_src, bias, adj, xw, *, heads, c_pad,
                  activation, tile, out_dtype):
    n_pad, d_pad = xw.shape
    assert d_pad == heads * c_pad
    src_rows = alpha_src.shape[0]
    kernel = functools.partial(_gat_attn_kernel, heads=heads, c_pad=c_pad,
                               negative_slope=0.2, activation=activation,
                               use_bf16_exp=USE_BF16_EXP)
    cost = pl.CostEstimate(
        flops=int(2 * heads * n_pad * n_pad * c_pad            # aggregation matmuls
                  + 8 * heads * n_pad * n_pad),                # softmax elementwise chain
        transcendentals=int(heads * n_pad * n_pad),
        bytes_accessed=int(n_pad * n_pad                       # int8 adjacency
                           + 2 * n_pad * d_pad                 # bf16 xw
                           + 4 * n_pad * d_pad                 # output (upper bound)
                           + 8 * n_pad * LANE))
    return pl.pallas_call(
        kernel,
        out_shape=jax.ShapeDtypeStruct((n_pad, d_pad), out_dtype),
        grid=(n_pad // tile,),
        in_specs=[
            pl.BlockSpec((tile, LANE), lambda i: (i, 0)),        # alpha_dst rows (pipelined)
            pl.BlockSpec((src_rows, n_pad), lambda i: (0, 0)),   # alpha_src (resident)
            pl.BlockSpec((1, d_pad), lambda i: (0, 0)),          # bias
            pl.BlockSpec((tile, n_pad), lambda i: (i, 0)),       # int8 adjacency rows
            pl.BlockSpec((n_pad, d_pad), lambda i: (0, 0)),      # xw: bf16 VMEM-resident
        ],
        out_specs=pl.BlockSpec((tile, d_pad), lambda i: (i, 0)),
        compiler_params=pltpu.CompilerParams(
            dimension_semantics=("parallel",),
            vmem_limit_bytes=VMEM_LIMIT),
        cost_estimate=cost,
    )(alpha_dst, alpha_src, bias, adj, xw)


# -------------------------------------------------------------------- model wrapper
def init_gatn_params(key, num_features, num_classes, hidden_dim, num_heads):
    """Deterministic glorot-style init matching PyG GATConv parameter shapes."""
    def glorot(k, shape, fan_in, fan_out):
        limit = (6.0 / (fan_in + fan_out)) ** 0.5
        return jax.random.uniform(k, shape, jnp.float32, -limit, limit)

    ks = jax.random.split(key, 6)
    h, c1 = num_heads, hidden_dim
    return {
        # gat1: in=num_features, out=hidden_dim, heads=num_heads, concat=True
        "w1": glorot(ks[0], (num_features, h * c1), num_features, h * c1),
        "att_src1": glorot(ks[1], (h, c1), c1, c1),
        "att_dst1": glorot(ks[2], (h, c1), c1, c1),
        "b1": jnp.zeros((1, h * c1), jnp.float32),
        # gat2: in=hidden_dim*num_heads, out=num_classes, heads=1, concat=True
        "w2": glorot(ks[3], (h * c1, num_classes), h * c1, num_classes),
        "att_src2": glorot(ks[4], (1, num_classes), num_classes, num_classes),
        "att_dst2": glorot(ks[5], (1, num_classes), num_classes, num_classes),
        "b2": jnp.zeros((1, num_classes), jnp.float32),
    }


def gatn_forward(params, x, edge_index, *, hidden_dim, num_heads, num_classes):
    n, f = x.shape
    n_pad = _round_up(n, TILE_DST)
    f_pad = _round_up(f, LANE)
    c1_pad = _round_up(hidden_dim, LANE)
    c2_pad = _round_up(num_classes, LANE)
    src_rows = min(LANE, _round_up(max(num_heads, 1), 8))
    assert num_heads <= LANE

    adj = build_adjacency(edge_index, n_pad)                  # int8 [n_pad, n_pad]

    # ---- layer 1 (heads=num_heads, concat) + fused ReLU ----
    x_p = jnp.zeros((n_pad, f_pad), jnp.bfloat16).at[:n, :f].set(x.astype(jnp.bfloat16))
    cols1 = _head_cols(num_heads, hidden_dim, c1_pad)
    w1_p = _embed(params["w1"], jnp.arange(f), cols1,
                  (f_pad, num_heads * c1_pad)).astype(jnp.bfloat16)
    b1_p = jnp.zeros((1, num_heads * c1_pad), jnp.float32).at[0, cols1].set(
        params["b1"][0])
    src1 = _pack_att_cols(params["att_src1"], c1_pad)
    dst1 = _pack_att_cols(params["att_dst1"], c1_pad)
    xw1, asrcT1, adst1 = project_and_alpha(x_p, w1_p, src1, dst1, TILE_DST)
    alpha_src1 = asrcT1[:, :src_rows].T                        # [src_rows, n_pad], once/layer
    h1 = gat_attention(adst1, alpha_src1, b1_p, adj, xw1,
                       heads=num_heads, c_pad=c1_pad, activation="relu",
                       tile=TILE_DST, out_dtype=jnp.bfloat16)

    # ---- layer 2 (heads=1) + fused sigmoid; consumes layer-1 bf16 padded layout ----
    cols2 = _head_cols(1, num_classes, c2_pad)
    w2_p = _embed(params["w2"], cols1, cols2,
                  (num_heads * c1_pad, c2_pad)).astype(jnp.bfloat16)
    b2_p = jnp.zeros((1, c2_pad), jnp.float32).at[0, cols2].set(params["b2"][0])
    src2 = _pack_att_cols(params["att_src2"], c2_pad)
    dst2 = _pack_att_cols(params["att_dst2"], c2_pad)
    xw2, asrcT2, adst2 = project_and_alpha(h1, w2_p, src2, dst2, TILE_DST)
    alpha_src2 = asrcT2[:, :8].T
    h2 = gat_attention(adst2, alpha_src2, b2_p, adj, xw2,
                       heads=1, c_pad=c2_pad, activation="sigmoid",
                       tile=TILE_DST, out_dtype=jnp.float32)

    return h2[:n, :num_classes]


if __name__ == "__main__":
    num_nodes = 16
    num_features = 8
    hidden_dim = 8
    num_heads = 2
    num_classes = 4
    num_edges = 32

    key = jax.random.PRNGKey(0)
    k_x, k_e, k_p = jax.random.split(key, 3)

    # Node features.
    x = jax.random.normal(k_x, (num_nodes, num_features), jnp.float32)

    # Deterministic edge set: unique directed (src != dst) pairs.
    all_src, all_dst = jnp.meshgrid(jnp.arange(num_nodes),
                                    jnp.arange(num_nodes), indexing="ij")
    pairs = jnp.stack([all_src.ravel(), all_dst.ravel()], axis=0)   # [2, N*N]
    keep = pairs[0] != pairs[1]
    pairs = pairs[:, keep]
    perm = jax.random.permutation(k_e, pairs.shape[1])
    edge_index = pairs[:, perm[:num_edges]].astype(jnp.int32)       # [2, E]

    params = init_gatn_params(k_p, num_features, num_classes,
                              hidden_dim, num_heads)

    out = gatn_forward(params, x, edge_index,
                       hidden_dim=hidden_dim, num_heads=num_heads,
                       num_classes=num_classes)
    out = jax.block_until_ready(out)

    assert out.shape == (num_nodes, num_classes), out.shape
    assert bool(jnp.all(jnp.isfinite(out)))
    assert bool(jnp.all((out >= 0.0) & (out <= 1.0)))   # sigmoid output range
    print("KERNEL_OK")
</pallas_src>

<mosaic_0001>
module attributes {stable_mosaic.version = 11 : i64} {
  func.func @_proj_kernel(%arg0: i32, %arg1: memref<128x128xbf16, #tpu.memory_space<vmem>>, %arg2: memref<128x256xbf16, #tpu.memory_space<vmem>>, %arg3: memref<256x128xbf16, #tpu.memory_space<vmem>>, %arg4: memref<256x128xbf16, #tpu.memory_space<vmem>>, %arg5: memref<128x256xbf16, #tpu.memory_space<vmem>>, %arg6: memref<128x128xf32, #tpu.memory_space<vmem>>, %arg7: memref<128x128xf32, #tpu.memory_space<vmem>>) attributes {dimension_semantics = [#tpu.dimension_semantics<parallel>], iteration_bounds = array<i64: 1>, scalar_prefetch = 0 : i64, scratch_operands = 0 : i64, tpu.core_type = #tpu.core_type<tc>, window_params = [{transform_indices = @transform_0, window_bounds = array<i64: 128, 128>}, {pipeline_mode = #tpu.pipeline_mode<synchronous>, transform_indices = @transform_1, window_bounds = array<i64: 128, 256>}, {pipeline_mode = #tpu.pipeline_mode<synchronous>, transform_indices = @transform_2, window_bounds = array<i64: 256, 128>}, {pipeline_mode = #tpu.pipeline_mode<synchronous>, transform_indices = @transform_3, window_bounds = array<i64: 256, 128>}, {transform_indices = @transform_4, window_bounds = array<i64: 128, 256>}, {transform_indices = @transform_5, window_bounds = array<i64: 128, 128>}, {transform_indices = @transform_6, window_bounds = array<i64: 128, 128>}]} {
    %c0 = arith.constant 0 : index
    %c0_0 = arith.constant 0 : index
    %0 = vector.load %arg1[%c0, %c0_0] : memref<128x128xbf16, #tpu.memory_space<vmem>>, vector<128x128xbf16>
    %c0_1 = arith.constant 0 : index
    %c0_2 = arith.constant 0 : index
    %1 = vector.load %arg2[%c0_1, %c0_2] : memref<128x256xbf16, #tpu.memory_space<vmem>>, vector<128x256xbf16>
    %cst = arith.constant dense<0.000000e+00> : vector<128x256xf32>
    %2 = tpu.matmul %0, %1, %cst {dimension_numbers = #tpu.dot_dimension_numbers<[1], [0], [0], [1], [0, 0, 1, 1], [], []>} : vector<128x128xbf16>, vector<128x256xbf16>, vector<128x256xf32> -> vector<128x256xf32>
    %3 = arith.truncf %2 : vector<128x256xf32> to vector<128x256xbf16>
    %c0_3 = arith.constant 0 : index
    %c0_4 = arith.constant 0 : index
    %4 = vector.load %arg5[%c0_3, %c0_4] : memref<128x256xbf16, #tpu.memory_space<vmem>>, vector<128x256xbf16>
    tpu.vector_store %arg5[%c0_3, %c0_4], %3 {strides = array<i32>} : memref<128x256xbf16, #tpu.memory_space<vmem>>, vector<128x256xbf16>,
    %c0_5 = arith.constant 0 : index
    %c0_6 = arith.constant 0 : index
    %5 = vector.load %arg3[%c0_5, %c0_6] : memref<256x128xbf16, #tpu.memory_space<vmem>>, vector<256x128xbf16>
    %cst_7 = arith.constant dense<0.000000e+00> : vector<128x128xf32>
    %6 = tpu.matmul %3, %5, %cst_7 {dimension_numbers = #tpu.dot_dimension_numbers<[1], [0], [0], [1], [0, 0, 1, 1], [], []>} : vector<128x256xbf16>, vector<256x128xbf16>, vector<128x128xf32> -> vector<128x128xf32>
    %c0_8 = arith.constant 0 : index
    %c0_9 = arith.constant 0 : index
    %7 = vector.load %arg6[%c0_8, %c0_9] : memref<128x128xf32, #tpu.memory_space<vmem>>, vector<128x128xf32>
    tpu.vector_store %arg6[%c0_8, %c0_9], %6 {strides = array<i32>} : memref<128x128xf32, #tpu.memory_space<vmem>>, vector<128x128xf32>,
    %c0_10 = arith.constant 0 : index
    %c0_11 = arith.constant 0 : index
    %8 = vector.load %arg4[%c0_10, %c0_11] : memref<256x128xbf16, #tpu.memory_space<vmem>>, vector<256x128xbf16>
    %cst_12 = arith.constant dense<0.000000e+00> : vector<128x128xf32>
    %9 = tpu.matmul %3, %8, %cst_12 {dimension_numbers = #tpu.dot_dimension_numbers<[1], [0], [0], [1], [0, 0, 1, 1], [], []>} : vector<128x256xbf16>, vector<256x128xbf16>, vector<128x128xf32> -> vector<128x128xf32>
    %c0_13 = arith.constant 0 : index
    %c0_14 = arith.constant 0 : index
    %10 = vector.load %arg7[%c0_13, %c0_14] : memref<128x128xf32, #tpu.memory_space<vmem>>, vector<128x128xf32>
    tpu.vector_store %arg7[%c0_13, %c0_14], %9 {strides = array<i32>} : memref<128x128xf32, #tpu.memory_space<vmem>>, vector<128x128xf32>,
    return
  }
  func.func @transform_0(%arg0: i32) -> (i32, i32) {
    %c0_i32 = arith.constant 0 : i32
    %c0_i32_0 = arith.constant 0 : i32
    return %arg0, %c0_i32 : i32, i32
  }
  func.func @transform_1(%arg0: i32) -> (i32, i32) {
    %c0_i32 = arith.constant 0 : i32
    %c0_i32_0 = arith.constant 0 : i32
    %c0_i32_1 = arith.constant 0 : i32
    return %c0_i32, %c0_i32_0 : i32, i32
  }
  func.func @transform_2(%arg0: i32) -> (i32, i32) {
    %c0_i32 = arith.constant 0 : i32
    %c0_i32_0 = arith.constant 0 : i32
    %c0_i32_1 = arith.constant 0 : i32
    return %c0_i32, %c0_i32_0 : i32, i32
  }
  func.func @transform_3(%arg0: i32) -> (i32, i32) {
    %c0_i32 = arith.constant 0 : i32
    %c0_i32_0 = arith.constant 0 : i32
    %c0_i32_1 = arith.constant 0 : i32
    return %c0_i32, %c0_i32_0 : i32, i32
  }
  func.func @transform_4(%arg0: i32) -> (i32, i32) {
    %c0_i32 = arith.constant 0 : i32
    %c0_i32_0 = arith.constant 0 : i32
    return %arg0, %c0_i32 : i32, i32
  }
  func.func @transform_5(%arg0: i32) -> (i32, i32) {
    %c0_i32 = arith.constant 0 : i32
    %c0_i32_0 = arith.constant 0 : i32
    return %arg0, %c0_i32 : i32, i32
  }
  func.func @transform_6(%arg0: i32) -> (i32, i32) {
    %c0_i32 = arith.constant 0 : i32
    %c0_i32_0 = arith.constant 0 : i32
    return %arg0, %c0_i32 : i32, i32
  }
}

</mosaic_0001>

<bundles_post_ra>
// kernel: tpu_custom_call.1
= control target key start
LH: loop header
LB: loop body
LE: loop exit
PB: predicated region body
PF: predicated region fallthrough
CT: control target
= control target key end

     0   :  { %12 = vsyncpa [#allocation3], 0  ;;  %s1653_s0 = inlined_call_operand.hbm [shape: bf16[128,128], index: 0, kind: input, shape index: {}]   ;;  %s1654_s1 = inlined_call_operand.hbm [shape: bf16[128,256], index: 1, kind: input, shape index: {}]   ;;  %s1655_s2 = inlined_call_operand.hbm [shape: bf16[256,128], index: 2, kind: input, shape index: {}]   ;;  %s1656_s3 = inlined_call_operand.hbm [shape: bf16[256,128], index: 3, kind: input, shape index: {}]   ;;  %s1657_s4 = inlined_call_operand.hbm [shape: bf16[128,256], index: 4, kind: output, shape index: {0}]   ;;  %s1658_s5 = inlined_call_operand.hbm [shape: f32[128,128], index: 5, kind: output, shape index: {1}]   ;;  %s1659_s6 = inlined_call_operand.hbm [shape: f32[128,128], index: 6, kind: output, shape index: {2}]  }
   0x1   :  { %13 = vsyncpa [#allocation6], 0 }
   0x2   :  { %14 = vsyncpa [#allocation9], 0 }
   0x3   :  { %15 = vsyncpa [#allocation4], 0 }
   0x4   :  { %16 = vsyncpa [#allocation12], 0  ;;  %s1467_s21 = smov [#allocation5]   ;;  %s1303_s25 = scalar_lea.hbm %s1654_s1, 2048 }
   0x5   :  { %s34_s22 = sshll.u32 %s1467_s21, 4  ;;  %p1304_p0 = scmp.ne.s32.totalorder %s1654_s1, %s1303_s25  ;;  %s35_s22 = int_to_ptr.vmem [resolvable:$true] %s34_s22 }
   0x6   :  { %p1307_p1 = scmp.lt.u32.totalorder %s1303_s25, %s1654_s1 }
   0x8   :  { %p1309_p2 = pnand %p1307_p1, %p1304_p0 }
   0xa   :  { %1312 = shalt.err (!%p1309_p2)
}
   0xb   :  { %s1313_s30 = scalar_lea.vmem %s35_s22, 2048  ;;  %p1318_p4 = scmp.lt.s32.totalorder %s35_s22, %s35_s22 }
   0xc   :  { %p1314_p3 = scmp.ne.s32.totalorder %s35_s22, %s1313_s30  ;;  %p1319_p5 = scmp.lt.s32.totalorder %s1313_s30, %s1313_s30 }
   0xe   :  { %p1320_p6 = por %p1319_p5, %p1318_p4 }
  0x10   :  { %p1321_p7 = pnand %p1320_p6, %p1314_p3 }
  0x12   :  { %1324 = shalt.err (!%p1321_p7)
}
  0x13   :  { %s1468_s7 = smov 128   ;;  %s1469_s8 = smov 8  }
  0x14   :  { %40 = dma.hbm_to_vmem [thread:$0]  %s1654_s1, 2048, %s35_s22, [#allocation6], %s1468_s7, %s1468_s7, %s1469_s8  }
  0x15   :  { %s1470_s11 = smov [#allocation2]   ;;  %s1325_s15 = scalar_lea.hbm %s1653_s0, 1024 }
  0x16   :  { %s22_s12 = sshll.u32 %s1470_s11, 4  ;;  %p1326_p8 = scmp.ne.s32.totalorder %s1653_s0, %s1325_s15  ;;  %s23_s12 = int_to_ptr.vmem [resolvable:$true] %s22_s12 }
  0x17   :  { %p1329_p9 = scmp.lt.u32.totalorder %s1325_s15, %s1653_s0 }
  0x19   :  { %p1331_p10 = pnand %p1329_p9, %p1326_p8 }
  0x1b   :  { %1334 = shalt.err (!%p1331_p10)
}
  0x1c   :  { %s1335_s20 = scalar_lea.vmem %s23_s12, 1024  ;;  %p1340_p12 = scmp.lt.s32.totalorder %s23_s12, %s23_s12 }
  0x1d   :  { %p1336_p11 = scmp.ne.s32.totalorder %s23_s12, %s1335_s20  ;;  %p1341_p13 = scmp.lt.s32.totalorder %s1335_s20, %s1335_s20 }
  0x1f   :  { %p1342_p0 = por %p1341_p13, %p1340_p12 }
  0x21   :  { %p1343_p1 = pnand %p1342_p0, %p1336_p11 }
  0x23   :  { %1346 = shalt.err (!%p1343_p1)
}
  0x24   :  { %s1471_s1 = smov 64   ;;  %s1472_s21 = smov 4  }
  0x25   :  { %28 = dma.hbm_to_vmem [thread:$0]  %s1653_s0, 1024, %s23_s12, [#allocation3], %s1471_s1, %s1471_s1, %s1472_s21  }
  0x26   :  { %s1473_s24 = smov [#allocation7]   ;;  %s1474_s26 = smov [#allocation8]  }
  0x27   :  { %s46_s25 = sshll.u32 %s1473_s24, 4  ;;  %s58_s27 = sshll.u32 %s1474_s26, 4  ;;  %s47_s25 = int_to_ptr.vmem [resolvable:$true] %s46_s25  ;;  %s1544_s27 = int_to_ptr.vmem [resolvable:$true] %s58_s27 }
  0x28   :  { %s1347_s30 = scalar_lea.hbm %s1655_s2, 2048 }
  0x29   :  { %p1348_p2 = scmp.ne.s32.totalorder %s1655_s2, %s1347_s30  ;;  %p1351_p3 = scmp.lt.u32.totalorder %s1347_s30, %s1655_s2 }
  0x2b   :  { %p1353_p4 = pnand %p1351_p3, %p1348_p2 }
  0x2d   :  { %1356 = shalt.err (!%p1353_p4)
}
  0x2e   :  { %s1357_s0 = scalar_lea.vmem %s47_s25, 2048  ;;  %p1362_p6 = scmp.lt.s32.totalorder %s47_s25, %s47_s25 }
  0x2f   :  { %p1358_p5 = scmp.ne.s32.totalorder %s47_s25, %s1357_s0  ;;  %p1363_p7 = scmp.lt.s32.totalorder %s1357_s0, %s1357_s0 }
  0x31   :  { %p1364_p8 = por %p1363_p7, %p1362_p6 }
  0x33   :  { %p1365_p9 = pnand %p1364_p8, %p1358_p5 }
  0x35   :  { %1368 = shalt.err (!%p1365_p9)
}
  0x36   :  { %52 = dma.hbm_to_vmem [thread:$0]  %s1655_s2, 2048, %s47_s25, [#allocation6], %s1471_s1, %s1471_s1, %s1472_s21  }
  0x37   :  { %s1369_s17 = scalar_lea.hbm %s1656_s3, 2048 }
  0x38   :  { %p1370_p10 = scmp.ne.s32.totalorder %s1656_s3, %s1369_s17  ;;  %p1373_p11 = scmp.lt.u32.totalorder %s1369_s17, %s1656_s3 }
  0x3a   :  { %p1375_p12 = pnand %p1373_p11, %p1370_p10 }
  0x3c   :  { %1378 = shalt.err (!%p1375_p12)
}
  0x3d   :  { %s1379_s23 = scalar_lea.vmem %s1544_s27, 2048  ;;  %p1384_p0 = scmp.lt.s32.totalorder %s1544_s27, %s1544_s27 }
  0x3e   :  { %p1380_p13 = scmp.ne.s32.totalorder %s1544_s27, %s1379_s23  ;;  %p1385_p1 = scmp.lt.s32.totalorder %s1379_s23, %s1379_s23 }
  0x40   :  { %p1386_p2 = por %p1385_p1, %p1384_p0 }
  0x42   :  { %p1387_p3 = pnand %p1386_p2, %p1380_p13 }
  0x44   :  { %1390 = shalt.err (!%p1387_p3)
}
  0x45   :  { %64 = dma.hbm_to_vmem [thread:$0]  %s1656_s3, 2048, %s1544_s27, [#allocation9], %s1471_s1, %s1471_s1, %s1472_s21  }
  0x46   :  { %1457 = dma.done.wait [#allocation3], 1024  }
  0x47   :  { %1458 = vsyncadd [#allocation3], 4294966272 }
  0x48   :  { %1459 = dma.done.wait [#allocation6], 4096  }
  0x49   :  { %1460 = vsyncadd [#allocation6], 4294963200 }
  0x4a   :  { %1461 = dma.done.wait [#allocation9], 2048  }
  0x4b   :  { %1462 = vsyncadd [#allocation9], 4294965248  ;;  %v1475_v0 = vmov 0   ;;  %v1239_v1 = vld [vmem:[#allocation5 + $0x4] ss:$8 sps:$4 sm:$0xff]   ;;  %v1279_v29 = vld [vmem:[#allocation7 + $0x50] sm:$0xff]  }
  0x4c   :  { %270 = vmatprep.mubr.bf16.mxu0 %v1475_v0  ;;  %310 = vmatprep.mubr.bf16.mxu1 %v1475_v0  ;;  %v1241_v2 = vld [vmem:[#allocation5] ss:$8 sps:$4 sm:$0xff]   ;;  %v1242_v3 = vld [vmem:[#allocation5 + $0x14] ss:$8 sps:$4 sm:$0xff]   ;;  %v1244_v4 = vld [vmem:[#allocation5 + $0x10] ss:$8 sps:$4 sm:$0xff]  }
  0x4d   :  { %238 = vmatprep.subr.bf16.mxu0 %v1239_v1  ;;  %1211 = vmatprep.subr.bf16.mxu1 %v1239_v1  ;;  %v1245_v5 = vld [vmem:[#allocation5 + $0x24] ss:$8 sps:$4 sm:$0xff]   ;;  %v1247_v6 = vld [vmem:[#allocation5 + $0x20] ss:$8 sps:$4 sm:$0xff]   ;;  %v1248_v7 = vld [vmem:[#allocation5 + $0x34] ss:$8 sps:$4 sm:$0xff]  }
  0x4e   :  { %239 = vmatpush1.bf16.msra.mxu0 %v1241_v2  ;;  %1219 = vmatpush1.bf16.msra.mxu1 %v1241_v2  ;;  %v1250_v8 = vld [vmem:[#allocation5 + $0x30] ss:$8 sps:$4 sm:$0xff]   ;;  %v1251_v9 = vld [vmem:[#allocation5 + $0x44] ss:$8 sps:$4 sm:$0xff]   ;;  %v1253_v10 = vld [vmem:[#allocation5 + $0x40] ss:$8 sps:$4 sm:$0xff]  }
  0x4f   :  { %240 = vmatprep.subr.bf16.mxu0 %v1242_v3  ;;  %1212 = vmatprep.subr.bf16.mxu1 %v1242_v3  ;;  %v1254_v11 = vld [vmem:[#allocation5 + $0x54] ss:$8 sps:$4 sm:$0xff]   ;;  %v1256_v12 = vld [vmem:[#allocation5 + $0x50] ss:$8 sps:$4 sm:$0xff]   ;;  %v1257_v13 = vld [vmem:[#allocation5 + $0x64] ss:$8 sps:$4 sm:$0xff]  }
  0x50   :  { %v1259_v14 = vld [vmem:[#allocation5 + $0x60] ss:$8 sps:$4 sm:$0xff]   ;;  %v1260_v15 = vld [vmem:[#allocation5 + $0x74] ss:$8 sps:$4 sm:$0xff]   ;;  %v1262_v16 = vld [vmem:[#allocation5 + $0x70] ss:$8 sps:$4 sm:$0xff]  }
  0x51   :  { %v1271_v17 = vld [vmem:[#allocation7 + $0x40] sm:$0xff]   ;;  %v1275_v23 = vld [vmem:[#allocation7 + $0x48] sm:$0xff]   ;;  %v1281_v30 = vld [vmem:[#allocation8 + $0x50] sm:$0xff]   ;;  %s1476_s3 = smov [#allocation10]  }
  0x52   :  { %241 = vmatpush1.bf16.msra.mxu0 %v1244_v4  ;;  %1220 = vmatpush1.bf16.msra.mxu1 %v1244_v4  ;;  %v1263_v18 = vld [vmem:[#allocation2] sm:$0xff]   ;;  %v1277_v24 = vld [vmem:[#allocation8 + $0x48] sm:$0xff]   ;;  %v1280_v31 = vld [vmem:[#allocation7 + $0x10] sm:$0xff]   ;;  %s950_s1 = sshll.u32 %s1476_s3, 4  ;;  %s951_s1 = int_to_ptr.vmem [resolvable:$true] %s950_s1 }
  0x53   :  { %242 = vmatprep.subr.bf16.mxu0 %v1245_v5  ;;  %1213 = vmatprep.subr.bf16.mxu1 %v1245_v5  ;;  %v1273_v19 = vld [vmem:[#allocation8 + $0x40] sm:$0xff]   ;;  %v1276_v25 = vld [vmem:[#allocation7 + $0x8] sm:$0xff]   ;;  %v1282_v32 = vld [vmem:[#allocation8 + $0x10] sm:$0xff]   ;;  %s1391_s21 = scalar_lea.vmem %s951_s1, 2048  ;;  %p1396_p5 = scmp.lt.s32.totalorder %s951_s1, %s951_s1 }
  0x54   :  { %v1267_v20 = vld [vmem:[#allocation2 + $0x20] sm:$0xff]   ;;  %v1278_v26 = vld [vmem:[#allocation8 + $0x8] sm:$0xff]   ;;  %v1283_v33 = vld [vmem:[#allocation7 + $0x58] sm:$0xff]   ;;  %p1392_p4 = scmp.ne.s32.totalorder %s951_s1, %s1391_s21  ;;  %p1397_p6 = scmp.lt.s32.totalorder %s1391_s21, %s1391_s21 }
  0x55   :  { %v1272_v21 = vld [vmem:[#allocation7] sm:$0xff]   ;;  %v1264_v27 = vld [vmem:[#allocation2 + $0x8] sm:$0xff]   ;;  %v1285_v34 = vld [vmem:[#allocation8 + $0x58] sm:$0xff]  }
  0x56   :  { %243 = vmatpush1.bf16.msra.mxu0 %v1247_v6  ;;  %1221 = vmatpush1.bf16.msra.mxu1 %v1247_v6  ;;  %v1274_v22 = vld [vmem:[#allocation8] sm:$0xff]   ;;  %v1268_v28 = vld [vmem:[#allocation2 + $0x28] sm:$0xff]   ;;  %v1284_v35 = vld [vmem:[#allocation7 + $0x18] sm:$0xff]   ;;  %p1398_p7 = por %p1397_p6, %p1396_p5 }
  0x57   :  { %244 = vmatprep.subr.bf16.mxu0 %v1248_v7  ;;  %1214 = vmatprep.subr.bf16.mxu1 %v1248_v7  ;;  %v1286_v36 = vld [vmem:[#allocation8 + $0x18] sm:$0xff]   ;;  %v1265_v37 = vld [vmem:[#allocation2 + $0x10] sm:$0xff]   ;;  %v1287_v39 = vld [vmem:[#allocation7 + $0x60] sm:$0xff]  }
  0x58   :  { %v1269_v38 = vld [vmem:[#allocation2 + $0x30] sm:$0xff]   ;;  %v1289_v40 = vld [vmem:[#allocation8 + $0x60] sm:$0xff]   ;;  %v1291_v43 = vld [vmem:[#allocation7 + $0x68] sm:$0xff]   ;;  %p1399_p8 = pnand %p1398_p7, %p1392_p4 }
  0x59   :  { %v1288_v41 = vld [vmem:[#allocation7 + $0x20] sm:$0xff]   ;;  %v1293_v44 = vld [vmem:[#allocation8 + $0x68] sm:$0xff]   ;;  %v1295_v47 = vld [vmem:[#allocation7 + $0x70] sm:$0xff]  }
  0x5a   :  { %245 = vmatpush1.bf16.msra.mxu0 %v1250_v8  ;;  %1222 = vmatpush1.bf16.msra.mxu1 %v1250_v8  ;;  %v1290_v42 = vld [vmem:[#allocation8 + $0x20] sm:$0xff]   ;;  %v1292_v45 = vld [vmem:[#allocation7 + $0x28] sm:$0xff]   ;;  %v1297_v48 = vld [vmem:[#allocation8 + $0x70] sm:$0xff]  }
  0x5b   :  { %246 = vmatprep.subr.bf16.mxu0 %v1251_v9  ;;  %1215 = vmatprep.subr.bf16.mxu1 %v1251_v9  ;;  %v1294_v46 = vld [vmem:[#allocation8 + $0x28] sm:$0xff]   ;;  %v1266_v49 = vld [vmem:[#allocation2 + $0x18] sm:$0xff]   ;;  %v1296_v51 = vld [vmem:[#allocation7 + $0x30] sm:$0xff]  }
  0x5c   :  { %v1270_v50 = vld [vmem:[#allocation2 + $0x38] sm:$0xff]   ;;  %v1298_v52 = vld [vmem:[#allocation8 + $0x30] sm:$0xff]  }
  0x5d   :  { %v1299_v53 = vld [vmem:[#allocation7 + $0x78] sm:$0xff]  }
  0x5e   :  { %247 = vmatpush1.bf16.msra.mxu0 %v1253_v10  ;;  %1223 = vmatpush1.bf16.msra.mxu1 %v1253_v10  ;;  %v1301_v54 = vld [vmem:[#allocation8 + $0x78] sm:$0xff]  }
  0x5f   :  { %248 = vmatprep.subr.bf16.mxu0 %v1254_v11  ;;  %1216 = vmatprep.subr.bf16.mxu1 %v1254_v11  ;;  %v1300_v55 = vld [vmem:[#allocation7 + $0x38] sm:$0xff]  }
  0x60   :  { %v1302_v56 = vld [vmem:[#allocation8 + $0x38] sm:$0xff]  }
  0x62   :  { %249 = vmatpush1.bf16.msra.mxu0 %v1256_v12  ;;  %1224 = vmatpush1.bf16.msra.mxu1 %v1256_v12 }
  0x63   :  { %250 = vmatprep.subr.bf16.mxu0 %v1257_v13  ;;  %1217 = vmatprep.subr.bf16.mxu1 %v1257_v13 }
  0x66   :  { %251 = vmatpush1.bf16.msra.mxu0 %v1259_v14  ;;  %1225 = vmatpush1.bf16.msra.mxu1 %v1259_v14 }
  0x67   :  { %252 = vmatprep.subr.bf16.mxu0 %v1260_v15  ;;  %1218 = vmatprep.subr.bf16.mxu1 %v1260_v15 }
  0x6a   :  { %253 = vmatpush1.bf16.msra.mxu0 %v1262_v16  ;;  %1226 = vmatpush1.bf16.msra.mxu1 %v1262_v16 }
  0x6b   :  { %1083 = vmatprep.subr.bf16.mxu1 %v1271_v17  ;;  %1147 = vmatprep.subr.bf16.mxu0 %v1273_v19 }
  0x6d   :  { %271 = vmatmul.mubr.bf16.vlgmr.msra.gmra.mrb[0].mxu0 %v1263_v18  ;;  %311 = vmatmul.mubr.bf16.vlgmr.msra.gmra.mrb[0].mxu1 %v1267_v20 }
  0x6e   :  { %280 = vmatprep.mubr.bf16.mxu0 %v1475_v0  ;;  %320 = vmatprep.mubr.bf16.mxu1 %v1475_v0 }
  0x6f   :  { %1084 = vmatpush3.bf16.msra.mxu1 %v1272_v21  ;;  %1148 = vmatpush3.bf16.msra.mxu0 %v1274_v22 }
  0x70   :  { %1085 = vmatprep.subr.bf16.mxu1 %v1275_v23  ;;  %1149 = vmatprep.subr.bf16.mxu0 %v1277_v24 }
  0x73   :  { %1086 = vmatpush3.bf16.msra.mxu1 %v1276_v25  ;;  %1150 = vmatpush3.bf16.msra.mxu0 %v1278_v26 }
  0x74   :  { %1087 = vmatprep.subr.bf16.mxu1 %v1279_v29  ;;  %1151 = vmatprep.subr.bf16.mxu0 %v1281_v30 }
  0x75   :  { %281 = vmatmul.mubr.bf16.gmra.mrb[4].mxu0 %v1264_v27  ;;  %321 = vmatmul.mubr.bf16.gmra.mrb[4].mxu1 %v1268_v28 }
  0x76   :  { %290 = vmatprep.mubr.bf16.mxu0 %v1475_v0  ;;  %330 = vmatprep.mubr.bf16.mxu1 %v1475_v0 }
  0x77   :  { %1088 = vmatpush3.bf16.msra.mxu1 %v1280_v31  ;;  %1152 = vmatpush3.bf16.msra.mxu0 %v1282_v32 }
  0x78   :  { %1089 = vmatprep.subr.bf16.mxu1 %v1283_v33  ;;  %1153 = vmatprep.subr.bf16.mxu0 %v1285_v34 }
  0x7b   :  { %1090 = vmatpush3.bf16.msra.mxu1 %v1284_v35  ;;  %1154 = vmatpush3.bf16.msra.mxu0 %v1286_v36 }
  0x7c   :  { %1091 = vmatprep.subr.bf16.mxu1 %v1287_v39  ;;  %1155 = vmatprep.subr.bf16.mxu0 %v1289_v40 }
  0x7d   :  { %291 = vmatmul.mubr.bf16.gmra.mrb[8].mxu0 %v1265_v37  ;;  %331 = vmatmul.mubr.bf16.gmra.mrb[8].mxu1 %v1269_v38 }
  0x7e   :  { %300 = vmatprep.mubr.bf16.mxu0 %v1475_v0  ;;  %340 = vmatprep.mubr.bf16.mxu1 %v1475_v0 }
  0x7f   :  { %1092 = vmatpush3.bf16.msra.mxu1 %v1288_v41  ;;  %1156 = vmatpush3.bf16.msra.mxu0 %v1290_v42 }
  0x80   :  { %1093 = vmatprep.subr.bf16.mxu1 %v1291_v43  ;;  %1157 = vmatprep.subr.bf16.mxu0 %v1293_v44 }
  0x83   :  { %1094 = vmatpush3.bf16.msra.mxu1 %v1292_v45  ;;  %1158 = vmatpush3.bf16.msra.mxu0 %v1294_v46 }
  0x84   :  { %1095 = vmatprep.subr.bf16.mxu1 %v1295_v47  ;;  %1159 = vmatprep.subr.bf16.mxu0 %v1297_v48 }
  0x85   :  { %301 = vmatmul.mubr.bf16.gmra.mrb[12].mxu0 %v1266_v49  ;;  %341 = vmatmul.mubr.bf16.gmra.mrb[12].mxu1 %v1270_v50 }
  0x87   :  { %1096 = vmatpush3.bf16.msra.mxu1 %v1296_v51  ;;  %1160 = vmatpush3.bf16.msra.mxu0 %v1298_v52 }
  0x88   :  { %1097 = vmatprep.subr.bf16.mxu1 %v1299_v53  ;;  %1161 = vmatprep.subr.bf16.mxu0 %v1301_v54 }
  0x8b   :  { %1098 = vmatpush3.bf16.msra.mxu1 %v1300_v55  ;;  %1162 = vmatpush3.bf16.msra.mxu0 %v1302_v56 }
 0x140   :  { %v272_v57 = vpop.f32.mrb[0].mxu0  ;;  %v312_v58 = vpop.f32.mrb[0].mxu1 }
 0x141   :  { %v274_v59 = vpop.f32.mrb[1].mxu0  ;;  %v314_v60 = vpop.f32.mrb[1].mxu1 }
 0x142   :  { %v1067_v61 = vpack.c.bf16 %v274_v59, %v272_v57  ;;  %v276_v62 = vpop.f32.mrb[2].mxu0  ;;  %v1075_v63 = vpack.c.bf16 %v314_v60, %v312_v58  ;;  %v316_v0 = vpop.f32.mrb[2].mxu1 }
 0x143   :  { %v351_v1 = vpack.c.bf16 %v276_v62, %v272_v57  ;;  %v278_v2 = vpop.f32.mrb[3].mxu0  ;;  %v1589_v3 = vpack.c.bf16 %v316_v0, %v312_v58  ;;  %v318_v4 = vpop.f32.mrb[3].mxu1 }
 0x144   :  { %447 = vst [vmem:[#allocation10] sm:$0xff] %v1067_v61  ;;  %v352_v5 = vpack.c.bf16 %v278_v2, %v274_v59  ;;  %v1068_v6 = vpack.c.bf16 %v278_v2, %v276_v62  ;;  %455 = vst [vmem:[#allocation10 + $0x40] sm:$0xff] %v1075_v63  ;;  %v1591_v7 = vpack.c.bf16 %v318_v4, %v314_v60 }
 0x145   :  { %v1076_v8 = vpack.c.bf16 %v318_v4, %v316_v0 }
 0x146   :  { %448 = vst [vmem:[#allocation10 + $0x8] sm:$0xff] %v1068_v6  ;;  %623 = vmatprep.mubr.bf16.mxu1 %v352_v5  ;;  %864 = vmatprep.mubr.bf16.mxu0 %v352_v5 }
 0x147   :  { %456 = vst [vmem:[#allocation10 + $0x48] sm:$0xff] %v1076_v8  ;;  %624 = vmatmul.mubr.bf16.vlgmr.msra.gmra.mrb[16].mxu1 %v351_v1  ;;  %865 = vmatmul.mubr.bf16.vlgmr.msra.gmra.mrb[16].mxu0 %v351_v1 }
 0x148   :  { %v282_v9 = vpop.f32.mrb[4].mxu0  ;;  %v322_v10 = vpop.f32.mrb[4].mxu1 }
 0x149   :  { %v284_v11 = vpop.f32.mrb[5].mxu0  ;;  %v324_v12 = vpop.f32.mrb[5].mxu1 }
 0x14a   :  { %v1069_v13 = vpack.c.bf16 %v284_v11, %v282_v9  ;;  %v286_v14 = vpop.f32.mrb[6].mxu0  ;;  %v1077_v15 = vpack.c.bf16 %v324_v12, %v322_v10  ;;  %v326_v16 = vpop.f32.mrb[6].mxu1 }
 0x14b   :  { %v353_v17 = vpack.c.bf16 %v286_v14, %v282_v9  ;;  %v288_v18 = vpop.f32.mrb[7].mxu0  ;;  %v1593_v19 = vpack.c.bf16 %v326_v16, %v322_v10  ;;  %v328_v20 = vpop.f32.mrb[7].mxu1 }
 0x14c   :  { %449 = vst [vmem:[#allocation10 + $0x10] sm:$0xff] %v1069_v13  ;;  %v354_v21 = vpack.c.bf16 %v288_v18, %v284_v11  ;;  %v1070_v22 = vpack.c.bf16 %v288_v18, %v286_v14  ;;  %457 = vst [vmem:[#allocation10 + $0x50] sm:$0xff] %v1077_v15  ;;  %v362_v23 = vpack.c.bf16 %v328_v20, %v324_v12 }
 0x14d   :  { %v1078_v24 = vpack.c.bf16 %v328_v20, %v326_v16 }
 0x14e   :  { %450 = vst [vmem:[#allocation10 + $0x18] sm:$0xff] %v1070_v22  ;;  %631 = vmatprep.mubr.bf16.mxu1 %v354_v21  ;;  %872 = vmatprep.mubr.bf16.mxu0 %v354_v21 }
 0x14f   :  { %458 = vst [vmem:[#allocation10 + $0x58] sm:$0xff] %v1078_v24  ;;  %632 = vmatmul.mubr.bf16.gmra.mrb[20].mxu1 %v353_v17  ;;  %873 = vmatmul.mubr.bf16.gmra.mrb[20].mxu0 %v353_v17 }
 0x150   :  { %v292_v25 = vpop.f32.mrb[8].mxu0  ;;  %v332_v26 = vpop.f32.mrb[8].mxu1 }
 0x151   :  { %v294_v27 = vpop.f32.mrb[9].mxu0  ;;  %v334_v28 = vpop.f32.mrb[9].mxu1 }
 0x152   :  { %v1071_v29 = vpack.c.bf16 %v294_v27, %v292_v25  ;;  %v296_v30 = vpop.f32.mrb[10].mxu0  ;;  %v1079_v31 = vpack.c.bf16 %v334_v28, %v332_v26  ;;  %v336_v32 = vpop.f32.mrb[10].mxu1 }
 0x153   :  { %v355_v33 = vpack.c.bf16 %v296_v30, %v292_v25  ;;  %v298_v34 = vpop.f32.mrb[11].mxu0  ;;  %v363_v35 = vpack.c.bf16 %v336_v32, %v332_v26  ;;  %v338_v36 = vpop.f32.mrb[11].mxu1 }
 0x154   :  { %451 = vst [vmem:[#allocation10 + $0x20] sm:$0xff] %v1071_v29  ;;  %v356_v37 = vpack.c.bf16 %v298_v34, %v294_v27  ;;  %v1072_v38 = vpack.c.bf16 %v298_v34, %v296_v30  ;;  %459 = vst [vmem:[#allocation10 + $0x60] sm:$0xff] %v1079_v31  ;;  %v364_v39 = vpack.c.bf16 %v338_v36, %v334_v28 }
 0x155   :  { %v1080_v40 = vpack.c.bf16 %v338_v36, %v336_v32 }
 0x156   :  { %452 = vst [vmem:[#allocation10 + $0x28] sm:$0xff] %v1072_v38  ;;  %639 = vmatprep.mubr.bf16.mxu1 %v356_v37  ;;  %880 = vmatprep.mubr.bf16.mxu0 %v356_v37 }
 0x157   :  { %460 = vst [vmem:[#allocation10 + $0x68] sm:$0xff] %v1080_v40  ;;  %640 = vmatmul.mubr.bf16.gmra.mrb[24].mxu1 %v355_v33  ;;  %881 = vmatmul.mubr.bf16.gmra.mrb[24].mxu0 %v355_v33 }
 0x158   :  { %v302_v41 = vpop.f32.mrb[12].mxu0  ;;  %v342_v42 = vpop.f32.mrb[12].mxu1 }
 0x159   :  { %v304_v43 = vpop.f32.mrb[13].mxu0  ;;  %v344_v44 = vpop.f32.mrb[13].mxu1 }
 0x15a   :  { %v1073_v45 = vpack.c.bf16 %v304_v43, %v302_v41  ;;  %v306_v46 = vpop.f32.mrb[14].mxu0  ;;  %v1081_v47 = vpack.c.bf16 %v344_v44, %v342_v42  ;;  %v346_v48 = vpop.f32.mrb[14].mxu1 }
 0x15b   :  { %v357_v49 = vpack.c.bf16 %v306_v46, %v302_v41  ;;  %v308_v50 = vpop.f32.mrb[15].mxu0  ;;  %v365_v51 = vpack.c.bf16 %v346_v48, %v342_v42  ;;  %v348_v52 = vpop.f32.mrb[15].mxu1 }
 0x15c   :  { %453 = vst [vmem:[#allocation10 + $0x30] sm:$0xff] %v1073_v45  ;;  %v358_v53 = vpack.c.bf16 %v308_v50, %v304_v43  ;;  %v1074_v54 = vpack.c.bf16 %v308_v50, %v306_v46  ;;  %461 = vst [vmem:[#allocation10 + $0x70] sm:$0xff] %v1081_v47  ;;  %v366_v55 = vpack.c.bf16 %v348_v52, %v344_v44 }
 0x15d   :  { %v1082_v56 = vpack.c.bf16 %v348_v52, %v346_v48 }
 0x15e   :  { %454 = vst [vmem:[#allocation10 + $0x38] sm:$0xff] %v1074_v54  ;;  %647 = vmatprep.mubr.bf16.mxu1 %v358_v53  ;;  %888 = vmatprep.mubr.bf16.mxu0 %v358_v53 }
 0x15f   :  { %462 = vst [vmem:[#allocation10 + $0x78] sm:$0xff] %v1082_v56  ;;  %648 = vmatmul.mubr.bf16.gmra.mrb[28].mxu1 %v357_v49  ;;  %889 = vmatmul.mubr.bf16.gmra.mrb[28].mxu0 %v357_v49 }
 0x160   :  { %655 = vmatprep.mubr.bf16.mxu1 %v1591_v7  ;;  %896 = vmatprep.mubr.bf16.mxu0 %v1591_v7 }
 0x167   :  { %656 = vmatmul.mubr.bf16.gmra.mrb[32].mxu1 %v1589_v3  ;;  %897 = vmatmul.mubr.bf16.gmra.mrb[32].mxu0 %v1589_v3 }
 0x168   :  { %663 = vmatprep.mubr.bf16.mxu1 %v362_v23  ;;  %904 = vmatprep.mubr.bf16.mxu0 %v362_v23 }
 0x16f   :  { %664 = vmatmul.mubr.bf16.gmra.mrb[36].mxu1 %v1593_v19  ;;  %905 = vmatmul.mubr.bf16.gmra.mrb[36].mxu0 %v1593_v19 }
 0x170   :  { %671 = vmatprep.mubr.bf16.mxu1 %v364_v39  ;;  %912 = vmatprep.mubr.bf16.mxu0 %v364_v39 }
 0x177   :  { %672 = vmatmul.mubr.bf16.gmra.mrb[40].mxu1 %v363_v35  ;;  %913 = vmatmul.mubr.bf16.gmra.mrb[40].mxu0 %v363_v35 }
 0x178   :  { %679 = vmatprep.mubr.bf16.mxu1 %v366_v55  ;;  %920 = vmatprep.mubr.bf16.mxu0 %v366_v55 }
 0x17f   :  { %680 = vmatmul.mubr.bf16.gmra.mrb[44].mxu1 %v365_v51  ;;  %921 = vmatmul.mubr.bf16.gmra.mrb[44].mxu0 %v365_v51 }
 0x180   :  { %1402 = shalt.err (!%p1399_p8)
}
 0x181   :  { %s1403_s27 = scalar_lea.hbm %s1657_s4, 2048 }
 0x182   :  { %p1404_p9 = scmp.ne.s32.totalorder %s1657_s4, %s1403_s27  ;;  %p1407_p10 = scmp.lt.u32.totalorder %s1403_s27, %s1657_s4 }
 0x184   :  { %p1409_p11 = pnand %p1407_p10, %p1404_p9 }
 0x186   :  { %1412 = shalt.err (!%p1409_p11)
}
 0x187   :  { %956 = dma.vmem_to_hbm [thread:$0]  %s951_s1, 2048, %s1657_s4, [#allocation4], %s1468_s7, %s1468_s7, %s1469_s8  }
 0x188   :  { %s1477_s4 = smov [#allocation11]   ;;  %s1478_s0 = smov [#allocation13]  }
 0x189   :  { %s962_s13 = sshll.u32 %s1477_s4, 4  ;;  %s974_s12 = sshll.u32 %s1478_s0, 4  ;;  %s963_s13 = int_to_ptr.vmem [resolvable:$true] %s962_s13  ;;  %s1616_s12 = int_to_ptr.vmem [resolvable:$true] %s974_s12 }
 0x18a   :  { %s1413_s14 = scalar_lea.vmem %s963_s13, 2048  ;;  %p1418_p13 = scmp.lt.s32.totalorder %s963_s13, %s963_s13 }
 0x18b   :  { %p1414_p12 = scmp.ne.s32.totalorder %s963_s13, %s1413_s14  ;;  %p1419_p0 = scmp.lt.s32.totalorder %s1413_s14, %s1413_s14 }
 0x18d   :  { %p1420_p1 = por %p1419_p0, %p1418_p13 }
 0x18f   :  { %p1421_p2 = pnand %p1420_p1, %p1414_p12 }
 0x21a   :  { %v1099_v57 = vpop.f32.mrb[16].mxu1  ;;  %v1163_v58 = vpop.f32.mrb[16].mxu0 }
 0x21b   :  { %v1100_v59 = vpop.f32.mrb[17].mxu1  ;;  %v1164_v60 = vpop.f32.mrb[17].mxu0 }
 0x21c   :  { %v1101_v61 = vadd.f32 %v1100_v59, %v1099_v57  ;;  %v1165_v62 = vadd.f32 %v1164_v60, %v1163_v58  ;;  %v1102_v63 = vpop.f32.mrb[18].mxu1  ;;  %v1166_v0 = vpop.f32.mrb[18].mxu0 }
 0x21d   :  { %v1103_v1 = vpop.f32.mrb[19].mxu1  ;;  %v1167_v2 = vpop.f32.mrb[19].mxu0 }
 0x21e   :  { %688 = vst [vmem:[#allocation11] sm:$0xff] %v1101_v61  ;;  %929 = vst [vmem:[#allocation13] sm:$0xff] %v1165_v62  ;;  %v1104_v3 = vadd.f32 %v1103_v1, %v1102_v63  ;;  %v1168_v4 = vadd.f32 %v1167_v2, %v1166_v0 }
 0x220   :  { %689 = vst [vmem:[#allocation11 + $0x8] sm:$0xff] %v1104_v3  ;;  %930 = vst [vmem:[#allocation13 + $0x8] sm:$0xff] %v1168_v4 }
 0x222   :  { %v1105_v5 = vpop.f32.mrb[20].mxu1  ;;  %v1169_v6 = vpop.f32.mrb[20].mxu0 }
 0x223   :  { %v1106_v7 = vpop.f32.mrb[21].mxu1  ;;  %v1170_v8 = vpop.f32.mrb[21].mxu0 }
 0x224   :  { %v1107_v9 = vadd.f32 %v1106_v7, %v1105_v5  ;;  %v1171_v10 = vadd.f32 %v1170_v8, %v1169_v6  ;;  %v1108_v11 = vpop.f32.mrb[22].mxu1  ;;  %v1172_v12 = vpop.f32.mrb[22].mxu0 }
 0x225   :  { %v1109_v13 = vpop.f32.mrb[23].mxu1  ;;  %v1173_v14 = vpop.f32.mrb[23].mxu0 }
 0x226   :  { %690 = vst [vmem:[#allocation11 + $0x10] sm:$0xff] %v1107_v9  ;;  %931 = vst [vmem:[#allocation13 + $0x10] sm:$0xff] %v1171_v10  ;;  %v1110_v15 = vadd.f32 %v1109_v13, %v1108_v11  ;;  %v1174_v16 = vadd.f32 %v1173_v14, %v1172_v12 }
 0x228   :  { %691 = vst [vmem:[#allocation11 + $0x18] sm:$0xff] %v1110_v15  ;;  %932 = vst [vmem:[#allocation13 + $0x18] sm:$0xff] %v1174_v16 }
 0x22a   :  { %v1111_v17 = vpop.f32.mrb[24].mxu1  ;;  %v1175_v18 = vpop.f32.mrb[24].mxu0 }
 0x22b   :  { %v1112_v19 = vpop.f32.mrb[25].mxu1  ;;  %v1176_v20 = vpop.f32.mrb[25].mxu0 }
 0x22c   :  { %v1113_v21 = vadd.f32 %v1112_v19, %v1111_v17  ;;  %v1177_v22 = vadd.f32 %v1176_v20, %v1175_v18  ;;  %v1114_v23 = vpop.f32.mrb[26].mxu1  ;;  %v1178_v24 = vpop.f32.mrb[26].mxu0 }
 0x22d   :  { %v1115_v25 = vpop.f32.mrb[27].mxu1  ;;  %v1179_v26 = vpop.f32.mrb[27].mxu0 }
 0x22e   :  { %692 = vst [vmem:[#allocation11 + $0x20] sm:$0xff] %v1113_v21  ;;  %933 = vst [vmem:[#allocation13 + $0x20] sm:$0xff] %v1177_v22  ;;  %v1116_v27 = vadd.f32 %v1115_v25, %v1114_v23  ;;  %v1180_v28 = vadd.f32 %v1179_v26, %v1178_v24 }
 0x230   :  { %693 = vst [vmem:[#allocation11 + $0x28] sm:$0xff] %v1116_v27  ;;  %934 = vst [vmem:[#allocation13 + $0x28] sm:$0xff] %v1180_v28 }
 0x232   :  { %v1117_v29 = vpop.f32.mrb[28].mxu1  ;;  %v1181_v30 = vpop.f32.mrb[28].mxu0 }
 0x233   :  { %v1118_v31 = vpop.f32.mrb[29].mxu1  ;;  %v1182_v32 = vpop.f32.mrb[29].mxu0 }
 0x234   :  { %v1119_v33 = vadd.f32 %v1118_v31, %v1117_v29  ;;  %v1183_v34 = vadd.f32 %v1182_v32, %v1181_v30  ;;  %v1120_v35 = vpop.f32.mrb[30].mxu1  ;;  %v1184_v36 = vpop.f32.mrb[30].mxu0 }
 0x235   :  { %v1121_v37 = vpop.f32.mrb[31].mxu1  ;;  %v1185_v38 = vpop.f32.mrb[31].mxu0 }
 0x236   :  { %694 = vst [vmem:[#allocation11 + $0x30] sm:$0xff] %v1119_v33  ;;  %935 = vst [vmem:[#allocation13 + $0x30] sm:$0xff] %v1183_v34  ;;  %v1122_v39 = vadd.f32 %v1121_v37, %v1120_v35  ;;  %v1186_v40 = vadd.f32 %v1185_v38, %v1184_v36 }
 0x238   :  { %695 = vst [vmem:[#allocation11 + $0x38] sm:$0xff] %v1122_v39  ;;  %936 = vst [vmem:[#allocation13 + $0x38] sm:$0xff] %v1186_v40 }
 0x23a   :  { %v1123_v41 = vpop.f32.mrb[32].mxu1  ;;  %v1187_v42 = vpop.f32.mrb[32].mxu0 }
 0x23b   :  { %v1124_v43 = vpop.f32.mrb[33].mxu1  ;;  %v1188_v44 = vpop.f32.mrb[33].mxu0 }
 0x23c   :  { %v1125_v45 = vadd.f32 %v1124_v43, %v1123_v41  ;;  %v1189_v46 = vadd.f32 %v1188_v44, %v1187_v42  ;;  %v1126_v47 = vpop.f32.mrb[34].mxu1  ;;  %v1190_v48 = vpop.f32.mrb[34].mxu0 }
 0x23d   :  { %v1127_v49 = vpop.f32.mrb[35].mxu1  ;;  %v1191_v50 = vpop.f32.mrb[35].mxu0 }
 0x23e   :  { %696 = vst [vmem:[#allocation11 + $0x40] sm:$0xff] %v1125_v45  ;;  %937 = vst [vmem:[#allocation13 + $0x40] sm:$0xff] %v1189_v46  ;;  %v1128_v51 = vadd.f32 %v1127_v49, %v1126_v47  ;;  %v1192_v52 = vadd.f32 %v1191_v50, %v1190_v48 }
 0x240   :  { %697 = vst [vmem:[#allocation11 + $0x48] sm:$0xff] %v1128_v51  ;;  %938 = vst [vmem:[#allocation13 + $0x48] sm:$0xff] %v1192_v52 }
 0x242   :  { %v1129_v53 = vpop.f32.mrb[36].mxu1  ;;  %v1193_v54 = vpop.f32.mrb[36].mxu0 }
 0x243   :  { %v1130_v55 = vpop.f32.mrb[37].mxu1  ;;  %v1194_v56 = vpop.f32.mrb[37].mxu0 }
 0x244   :  { %v1131_v57 = vadd.f32 %v1130_v55, %v1129_v53  ;;  %v1195_v58 = vadd.f32 %v1194_v56, %v1193_v54  ;;  %v1132_v59 = vpop.f32.mrb[38].mxu1  ;;  %v1196_v60 = vpop.f32.mrb[38].mxu0 }
 0x245   :  { %v1133_v61 = vpop.f32.mrb[39].mxu1  ;;  %v1197_v62 = vpop.f32.mrb[39].mxu0 }
 0x246   :  { %698 = vst [vmem:[#allocation11 + $0x50] sm:$0xff] %v1131_v57  ;;  %939 = vst [vmem:[#allocation13 + $0x50] sm:$0xff] %v1195_v58  ;;  %v1134_v63 = vadd.f32 %v1133_v61, %v1132_v59  ;;  %v1198_v0 = vadd.f32 %v1197_v62, %v1196_v60 }
 0x248   :  { %699 = vst [vmem:[#allocation11 + $0x58] sm:$0xff] %v1134_v63  ;;  %940 = vst [vmem:[#allocation13 + $0x58] sm:$0xff] %v1198_v0 }
 0x24a   :  { %v1135_v1 = vpop.f32.mrb[40].mxu1  ;;  %v1199_v2 = vpop.f32.mrb[40].mxu0 }
 0x24b   :  { %v1136_v3 = vpop.f32.mrb[41].mxu1  ;;  %v1200_v4 = vpop.f32.mrb[41].mxu0 }
 0x24c   :  { %v1137_v5 = vadd.f32 %v1136_v3, %v1135_v1  ;;  %v1201_v6 = vadd.f32 %v1200_v4, %v1199_v2  ;;  %v1138_v7 = vpop.f32.mrb[42].mxu1  ;;  %v1202_v8 = vpop.f32.mrb[42].mxu0 }
 0x24d   :  { %v1139_v9 = vpop.f32.mrb[43].mxu1  ;;  %v1203_v10 = vpop.f32.mrb[43].mxu0 }
 0x24e   :  { %700 = vst [vmem:[#allocation11 + $0x60] sm:$0xff] %v1137_v5  ;;  %941 = vst [vmem:[#allocation13 + $0x60] sm:$0xff] %v1201_v6  ;;  %v1140_v11 = vadd.f32 %v1139_v9, %v1138_v7  ;;  %v1204_v12 = vadd.f32 %v1203_v10, %v1202_v8 }
 0x250   :  { %701 = vst [vmem:[#allocation11 + $0x68] sm:$0xff] %v1140_v11  ;;  %942 = vst [vmem:[#allocation13 + $0x68] sm:$0xff] %v1204_v12 }
 0x252   :  { %v1141_v13 = vpop.f32.mrb[44].mxu1  ;;  %v1205_v14 = vpop.f32.mrb[44].mxu0 }
 0x253   :  { %v1142_v15 = vpop.f32.mrb[45].mxu1  ;;  %v1206_v16 = vpop.f32.mrb[45].mxu0 }
 0x254   :  { %v1143_v17 = vadd.f32 %v1142_v15, %v1141_v13  ;;  %v1207_v18 = vadd.f32 %v1206_v16, %v1205_v14  ;;  %v1144_v19 = vpop.f32.mrb[46].mxu1  ;;  %v1208_v20 = vpop.f32.mrb[46].mxu0 }
 0x255   :  { %v1145_v21 = vpop.f32.mrb[47].mxu1  ;;  %v1209_v22 = vpop.f32.mrb[47].mxu0 }
 0x256   :  { %702 = vst [vmem:[#allocation11 + $0x70] sm:$0xff] %v1143_v17  ;;  %943 = vst [vmem:[#allocation13 + $0x70] sm:$0xff] %v1207_v18  ;;  %v1146_v23 = vadd.f32 %v1145_v21, %v1144_v19  ;;  %v1210_v24 = vadd.f32 %v1209_v22, %v1208_v20 }
 0x258   :  { %703 = vst [vmem:[#allocation11 + $0x78] sm:$0xff] %v1146_v23  ;;  %944 = vst [vmem:[#allocation13 + $0x78] sm:$0xff] %v1210_v24 }
 0x259   :  { %1424 = shalt.err (!%p1421_p2)
}
 0x25a   :  { %s1425_s17 = scalar_lea.hbm %s1658_s5, 2048 }
 0x25b   :  { %p1426_p3 = scmp.ne.s32.totalorder %s1658_s5, %s1425_s17  ;;  %p1429_p4 = scmp.lt.u32.totalorder %s1425_s17, %s1658_s5 }
 0x25d   :  { %p1431_p5 = pnand %p1429_p4, %p1426_p3 }
 0x25f   :  { %1434 = shalt.err (!%p1431_p5)
}
 0x260   :  { %968 = dma.vmem_to_hbm [thread:$0]  %s963_s13, 2048, %s1658_s5, [#allocation12], %s1468_s7, %s1468_s7, %s1469_s8  }
 0x261   :  { %s1435_s24 = scalar_lea.vmem %s1616_s12, 2048  ;;  %p1440_p7 = scmp.lt.s32.totalorder %s1616_s12, %s1616_s12 }
 0x262   :  { %p1436_p6 = scmp.ne.s32.totalorder %s1616_s12, %s1435_s24  ;;  %p1441_p8 = scmp.lt.s32.totalorder %s1435_s24, %s1435_s24 }
 0x264   :  { %p1442_p9 = por %p1441_p8, %p1440_p7 }
 0x266   :  { %p1443_p10 = pnand %p1442_p9, %p1436_p6 }
 0x268   :  { %1446 = shalt.err (!%p1443_p10)
}
 0x269   :  { %s1447_s21 = scalar_lea.hbm %s1659_s6, 2048 }
 0x26a   :  { %p1448_p11 = scmp.ne.s32.totalorder %s1659_s6, %s1447_s21  ;;  %p1451_p12 = scmp.lt.u32.totalorder %s1447_s21, %s1659_s6 }
 0x26c   :  { %p1453_p13 = pnand %p1451_p12, %p1448_p11 }
 0x26e   :  { %1456 = shalt.err (!%p1453_p13)
}
 0x26f   :  { %980 = dma.vmem_to_hbm [thread:$0]  %s1616_s12, 2048, %s1659_s6, [#allocation12], %s1468_s7, %s1468_s7, %s1469_s8  }
 0x270   :  { %1463 = dma.done.wait [#allocation4], 2048  }
 0x271   :  { %1464 = vsyncadd [#allocation4], 4294965248 }
 0x272   :  { %1465 = dma.done.wait [#allocation12], 4096  }
 0x273   :  { %1466 = vsyncadd [#allocation12], 4294963200 }
 0x274   :  { %990 = vsyncpa [#allocation3], 1 }
 0x275   :  { %991 = vsyncpa [#allocation6], 1 }
 0x276   :  { %992 = vsyncpa [#allocation9], 1 }
 0x277   :  { %993 = vsyncpa [#allocation4], 1 }
 0x278   :  { %994 = vsyncpa [#allocation12], 1 }

</bundles_post_ra>
